<compile_context>
chip_gen: v7x
topology: tpu7x:2x2x1
jax: 0.10.0
libtpu: 0.0.40
codegen_flags: <defaults>
</compile_context>

<pallas_src>
import math

import jax
import jax.numpy as jnp
from jax import lax
from jax.experimental import pallas as pl
from jax.experimental.pallas import tpu as pltpu

FREQ_EMB_SIZE = 256      # frequency_embedding_size
MAX_PERIOD = 10000.0


def _timestep_embedder_kernel(t_ref, w1_ref, b1_ref, w2_ref, b2_ref, out_ref):
    """One grid step: recompute hidden activations, emit one column tile."""
    half = FREQ_EMB_SIZE // 2  # 128

    # --- sinusoidal embedding (no concat) + first Linear + SiLU, all in f32 --
    # freqs = exp(-log(max_period) * arange(half) / half), shape (1, half)
    idx = lax.broadcasted_iota(jnp.int32, (1, half), 1).astype(jnp.float32)
    freqs = jnp.exp(idx * (-math.log(MAX_PERIOD) / half))

    args = t_ref[...] * freqs                     # (B, half) f32
    cos_e = jnp.cos(args).astype(w1_ref.dtype)
    sin_e = jnp.sin(args).astype(w1_ref.dtype)

    # emb @ w1 without materializing the (B, 256) concat:
    # split w1 into its cos rows (0:half) and sin rows (half:2*half).
    h = jnp.dot(cos_e, w1_ref[pl.ds(0, half), :],
                preferred_element_type=jnp.float32)
    h = h + jnp.dot(sin_e, w1_ref[pl.ds(half, half), :],
                    preferred_element_type=jnp.float32)
    h = h + b1_ref[...]                           # f32 bias
    h = h * jax.nn.sigmoid(h)                     # SiLU in f32

    # --- second Linear: one (H, TN) weight tile per grid step ---------------
    out = jnp.dot(h.astype(w2_ref.dtype), w2_ref[...],
                  preferred_element_type=jnp.float32)
    out_ref[...] = (out + b2_ref[...]).astype(out_ref.dtype)


def _physical_vmem_bytes():
    """Per-device VMEM capacity; conservative (v7x) fallback if unavailable."""
    try:
        info = pltpu.get_tpu_info()
    except Exception:
        return 64 << 20
    for name in ("vmem_capacity_bytes", "vmem_size_bytes", "vmem_bytes"):
        v = getattr(info, name, None)
        if isinstance(v, int) and v > 0:
            return v
    return 64 << 20


def _choose_tn(H, max_tn, tn=None):
    """Largest lane-dense column tile dividing H that fits the VMEM budget."""
    if tn is not None:
        assert H % tn == 0 and (tn % 128 == 0 or tn == H), "bad tile size"
        return tn
    if H <= max_tn or H % 128 != 0:
        # Single full-H tile (also the fallback for non-lane-aligned small H).
        return H
    cands = [d for d in range(128, H, 128) if H % d == 0]
    fits = [d for d in cands if d <= max_tn]
    if fits:
        return max(fits)
    return min(cands) if cands else H


def timestep_embedder_pallas(t, w1, b1, w2, b2, *, tn=None):
    """t: (B,); w1: (256, H); b1: (H,); w2: (H, H); b2: (H,) -> (B, H) f32.

    w1/w2 may be bf16 (recommended: halves weight DMA); biases are taken in f32.
    """
    B = t.shape[0]
    F, H = w1.shape
    assert F == FREQ_EMB_SIZE and w2.shape == (H, H)

    B_pad = ((B + 7) // 8) * 8                       # sublane-friendly batch
    t2d = jnp.zeros((B_pad, 1), jnp.float32).at[:B, 0].set(t.astype(jnp.float32))
    b1_2d = b1.astype(jnp.float32).reshape(1, H)
    b2_2d = b2.astype(jnp.float32).reshape(1, H)

    w1_it = jnp.dtype(w1.dtype).itemsize
    w2_it = jnp.dtype(w2.dtype).itemsize

    # --- VMEM budget (generation aware) and tile-size derivation -------------
    # ~78% of physical VMEM: ≈50 MiB on v7x (64 MiB), ≈100 MiB on v5e/v6e
    # (128 MiB) — leaves headroom for Mosaic internal scratch.
    budget = int(_physical_vmem_bytes() * 0.78)

    # Per-step-independent VMEM: resident inputs (double-buffered by Pallas)
    # plus kernel-internal f32 temps plus fixed headroom.
    fixed = (2 * B_pad * 4                              # t
             + 2 * FREQ_EMB_SIZE * H * w1_it            # w1
             + 2 * H * 4                                # b1
             + B_pad * FREQ_EMB_SIZE * 8                # args/cos/sin temps
             + B_pad * H * (4 + w1_it)                  # h (f32) + h cast
             + (4 << 20))                               # compiler headroom
    # Per-output-column VMEM (double-buffered): w2 column + out column + b2.
    per_col = 2 * (H * w2_it + B_pad * 4 + 4)
    max_tn = max((budget - fixed) // per_col, 0)

    TN = _choose_tn(H, max_tn, tn)
    grid = (H // TN,)

    vmem_est = fixed + per_col * TN
    vmem_limit = int(min(max(vmem_est, 16 << 20), budget))

    out = pl.pallas_call(
        _timestep_embedder_kernel,
        out_shape=jax.ShapeDtypeStruct((B_pad, H), jnp.float32),
        grid=grid,
        in_specs=[
            pl.BlockSpec((B_pad, 1), lambda j: (0, 0)),           # t (resident)
            pl.BlockSpec((FREQ_EMB_SIZE, H), lambda j: (0, 0)),   # w1 (resident)
            pl.BlockSpec((1, H), lambda j: (0, 0)),               # b1 (resident)
            pl.BlockSpec((H, TN), lambda j: (0, j)),              # w2 (streamed)
            pl.BlockSpec((1, TN), lambda j: (0, j)),              # b2 (streamed)
        ],
        out_specs=pl.BlockSpec((B_pad, TN), lambda j: (0, j)),
        compiler_params=pltpu.CompilerParams(
            # Hidden layer is recomputed every step, so the column axis is
            # safely "parallel" (v7x megacore splits the w2 streaming).
            dimension_semantics=("parallel",),
            vmem_limit_bytes=vmem_limit,
        ),
    )(t2d, w1, b1_2d, w2, b2_2d)
    return out[:B]


def timestep_embedder_ref(t, w1, b1, w2, b2):
    """Pure-JAX f32 reference mirroring the PyTorch module."""
    half = FREQ_EMB_SIZE // 2
    freqs = jnp.exp(
        -math.log(MAX_PERIOD) * jnp.arange(half, dtype=jnp.float32) / half
    )
    args = t.astype(jnp.float32)[:, None] * freqs[None]
    emb = jnp.concatenate([jnp.cos(args), jnp.sin(args)], axis=-1)
    h = emb @ w1.astype(jnp.float32) + b1.astype(jnp.float32)
    h = h * jax.nn.sigmoid(h)
    return h @ w2.astype(jnp.float32) + b2.astype(jnp.float32)


if __name__ == "__main__":
    key = jax.random.PRNGKey(0)

    # --- Config 1: lane-dense H, bf16 weights, default (single full-H tile) --
    B, H = 8, 256
    k_t, k_w1, k_b1, k_w2, k_b2 = jax.random.split(key, 5)
    t = jax.random.uniform(k_t, (B,), jnp.float32, 0.0, 1000.0)
    w1 = (jax.random.normal(k_w1, (FREQ_EMB_SIZE, H), jnp.float32) * 0.02
          ).astype(jnp.bfloat16)
    b1 = jax.random.normal(k_b1, (H,), jnp.float32) * 0.02
    w2 = (jax.random.normal(k_w2, (H, H), jnp.float32) * 0.02
          ).astype(jnp.bfloat16)
    b2 = jax.random.normal(k_b2, (H,), jnp.float32) * 0.02

    out = jax.block_until_ready(timestep_embedder_pallas(t, w1, b1, w2, b2))
    ref = timestep_embedder_ref(t, w1, b1, w2, b2)
    assert out.shape == (B, H)
    assert jnp.allclose(out, ref, atol=2e-2, rtol=2e-2), "bf16 path mismatch"

    # --- Config 1b: force a 2-step streamed grid (parallel axis correctness) -
    out_s = jax.block_until_ready(
        timestep_embedder_pallas(t, w1, b1, w2, b2, tn=128))
    assert jnp.allclose(out_s, ref, atol=2e-2, rtol=2e-2), "streamed path mismatch"

    # --- Config 2: tiny ragged batch, small H (full-H tile fallback), f32 ----
    B2, H2 = 5, 32
    k2 = jax.random.split(jax.random.PRNGKey(1), 5)
    t2 = jax.random.uniform(k2[0], (B2,), jnp.float32, 0.0, 1000.0)
    w1f = jax.random.normal(k2[1], (FREQ_EMB_SIZE, H2), jnp.float32) * 0.02
    b1f = jax.random.normal(k2[2], (H2,), jnp.float32) * 0.02
    w2f = jax.random.normal(k2[3], (H2, H2), jnp.float32) * 0.02
    b2f = jax.random.normal(k2[4], (H2,), jnp.float32) * 0.02

    out2 = jax.block_until_ready(
        timestep_embedder_pallas(t2, w1f, b1f, w2f, b2f))
    ref2 = timestep_embedder_ref(t2, w1f, b1f, w2f, b2f)
    assert out2.shape == (B2, H2)
    assert jnp.allclose(out2, ref2, atol=1e-4, rtol=1e-4), "f32 path mismatch"

    print("KERNEL_OK")
</pallas_src>

<mosaic_0001>
module attributes {stable_mosaic.version = 11 : i64} {
  func.func @_timestep_embedder_kernel(%arg0: i32, %arg1: memref<8x1xf32, #tpu.memory_space<vmem>>, %arg2: memref<256x256xbf16, #tpu.memory_space<vmem>>, %arg3: memref<1x256xf32, #tpu.memory_space<vmem>>, %arg4: memref<256x256xbf16, #tpu.memory_space<vmem>>, %arg5: memref<1x256xf32, #tpu.memory_space<vmem>>, %arg6: memref<8x256xf32, #tpu.memory_space<vmem>>) attributes {dimension_semantics = [#tpu.dimension_semantics<parallel>], iteration_bounds = array<i64: 1>, scalar_prefetch = 0 : i64, scratch_operands = 0 : i64, tpu.core_type = #tpu.core_type<tc>, window_params = [{pipeline_mode = #tpu.pipeline_mode<synchronous>, transform_indices = @transform_0, window_bounds = array<i64: 8, 1>}, {pipeline_mode = #tpu.pipeline_mode<synchronous>, transform_indices = @transform_1, window_bounds = array<i64: 256, 256>}, {pipeline_mode = #tpu.pipeline_mode<synchronous>, transform_indices = @transform_2, window_bounds = array<i64: 1, 256>}, {transform_indices = @transform_3, window_bounds = array<i64: 256, 256>}, {transform_indices = @transform_4, window_bounds = array<i64: 1, 256>}, {transform_indices = @transform_5, window_bounds = array<i64: 8, 256>}]} {
    %0 = tpu.iota {dimensions = array<i32: 1>} : vector<1x128xi32>
    %1 = arith.sitofp %0 : vector<1x128xi32> to vector<1x128xf32>
    %cst = arith.constant -0.0719557852 : f32
    %2 = vector.broadcast %cst : f32 to vector<1x128xf32>
    %3 = arith.mulf %1, %2 : vector<1x128xf32>
    %4 = math.exp %3 : vector<1x128xf32>
    %c0 = arith.constant 0 : index
    %c0_0 = arith.constant 0 : index
    %5 = vector.load %arg1[%c0, %c0_0] : memref<8x1xf32, #tpu.memory_space<vmem>>, vector<8x1xf32>
    %6 = vector.broadcast %5 : vector<8x1xf32> to vector<8x128xf32>
    %7 = vector.broadcast %4 : vector<1x128xf32> to vector<8x128xf32>
    %8 = arith.mulf %6, %7 : vector<8x128xf32>
    %9 = math.cos %8 : vector<8x128xf32>
    %10 = arith.truncf %9 : vector<8x128xf32> to vector<8x128xbf16>
    %11 = math.sin %8 : vector<8x128xf32>
    %12 = arith.truncf %11 : vector<8x128xf32> to vector<8x128xbf16>
    %c0_1 = arith.constant 0 : index
    %c0_2 = arith.constant 0 : index
    %13 = vector.load %arg2[%c0_1, %c0_2] : memref<256x256xbf16, #tpu.memory_space<vmem>>, vector<128x256xbf16>
    %cst_3 = arith.constant dense<0.000000e+00> : vector<8x256xf32>
    %14 = tpu.matmul %10, %13, %cst_3 {dimension_numbers = #tpu.dot_dimension_numbers<[1], [0], [0], [1], [0, 0, 1, 1], [], []>} : vector<8x128xbf16>, vector<128x256xbf16>, vector<8x256xf32> -> vector<8x256xf32>
    %c128 = arith.constant 128 : index
    %c0_4 = arith.constant 0 : index
    %15 = vector.load %arg2[%c128, %c0_4] : memref<256x256xbf16, #tpu.memory_space<vmem>>, vector<128x256xbf16>
    %cst_5 = arith.constant dense<0.000000e+00> : vector<8x256xf32>
    %16 = tpu.matmul %12, %15, %cst_5 {dimension_numbers = #tpu.dot_dimension_numbers<[1], [0], [0], [1], [0, 0, 1, 1], [], []>} : vector<8x128xbf16>, vector<128x256xbf16>, vector<8x256xf32> -> vector<8x256xf32>
    %17 = arith.addf %14, %16 : vector<8x256xf32>
    %c0_6 = arith.constant 0 : index
    %c0_7 = arith.constant 0 : index
    %18 = vector.load %arg3[%c0_6, %c0_7] : memref<1x256xf32, #tpu.memory_space<vmem>>, vector<1x256xf32>
    %19 = vector.broadcast %18 : vector<1x256xf32> to vector<8x256xf32>
    %20 = arith.addf %17, %19 : vector<8x256xf32>
    %21 = arith.negf %20 : vector<8x256xf32>
    %22 = math.exp %21 : vector<8x256xf32>
    %cst_8 = arith.constant 1.000000e+00 : f32
    %23 = vector.broadcast %cst_8 : f32 to vector<8x256xf32>
    %24 = arith.addf %23, %22 : vector<8x256xf32>
    %25 = arith.divf %23, %24 : vector<8x256xf32>
    %26 = arith.mulf %20, %25 : vector<8x256xf32>
    %27 = arith.truncf %26 : vector<8x256xf32> to vector<8x256xbf16>
    %c0_9 = arith.constant 0 : index
    %c0_10 = arith.constant 0 : index
    %28 = vector.load %arg4[%c0_9, %c0_10] : memref<256x256xbf16, #tpu.memory_space<vmem>>, vector<256x256xbf16>
    %cst_11 = arith.constant dense<0.000000e+00> : vector<8x256xf32>
    %29 = tpu.matmul %27, %28, %cst_11 {dimension_numbers = #tpu.dot_dimension_numbers<[1], [0], [0], [1], [0, 0, 1, 1], [], []>} : vector<8x256xbf16>, vector<256x256xbf16>, vector<8x256xf32> -> vector<8x256xf32>
    %c0_12 = arith.constant 0 : index
    %c0_13 = arith.constant 0 : index
    %30 = vector.load %arg5[%c0_12, %c0_13] : memref<1x256xf32, #tpu.memory_space<vmem>>, vector<1x256xf32>
    %31 = vector.broadcast %30 : vector<1x256xf32> to vector<8x256xf32>
    %32 = arith.addf %29, %31 : vector<8x256xf32>
    %c0_14 = arith.constant 0 : index
    %c0_15 = arith.constant 0 : index
    %33 = vector.load %arg6[%c0_14, %c0_15] : memref<8x256xf32, #tpu.memory_space<vmem>>, vector<8x256xf32>
    tpu.vector_store %arg6[%c0_14, %c0_15], %32 {strides = array<i32>} : memref<8x256xf32, #tpu.memory_space<vmem>>, vector<8x256xf32>,
    return
  }
  func.func @transform_0(%arg0: i32) -> (i32, i32) {
    %c0_i32 = arith.constant 0 : i32
    %c0_i32_0 = arith.constant 0 : i32
    %c0_i32_1 = arith.constant 0 : i32
    return %c0_i32, %c0_i32_0 : i32, i32
  }
  func.func @transform_1(%arg0: i32) -> (i32, i32) {
    %c0_i32 = arith.constant 0 : i32
    %c0_i32_0 = arith.constant 0 : i32
    %c0_i32_1 = arith.constant 0 : i32
    return %c0_i32, %c0_i32_0 : i32, i32
  }
  func.func @transform_2(%arg0: i32) -> (i32, i32) {
    %c0_i32 = arith.constant 0 : i32
    %c0_i32_0 = arith.constant 0 : i32
    %c0_i32_1 = arith.constant 0 : i32
    return %c0_i32, %c0_i32_0 : i32, i32
  }
  func.func @transform_3(%arg0: i32) -> (i32, i32) {
    %c0_i32 = arith.constant 0 : i32
    %c0_i32_0 = arith.constant 0 : i32
    return %c0_i32, %arg0 : i32, i32
  }
  func.func @transform_4(%arg0: i32) -> (i32, i32) {
    %c0_i32 = arith.constant 0 : i32
    %c0_i32_0 = arith.constant 0 : i32
    return %c0_i32, %arg0 : i32, i32
  }
  func.func @transform_5(%arg0: i32) -> (i32, i32) {
    %c0_i32 = arith.constant 0 : i32
    %c0_i32_0 = arith.constant 0 : i32
    return %c0_i32, %arg0 : i32, i32
  }
}

</mosaic_0001>

<bundles_post_ra>
// kernel: tpu_custom_call.1
= control target key start
LH: loop header
LB: loop body
LE: loop exit
PB: predicated region body
PF: predicated region fallthrough
CT: control target
= control target key end

     0   :  { %10 = vsyncpa [#allocation3], 0  ;;  %s1229_s0 = inlined_call_operand.vmem [shape: f32[8,1], index: 0, kind: input, shape index: {}]   ;;  %s1230_s1 = inlined_call_operand.hbm [shape: bf16[256,256], index: 1, kind: input, shape index: {}]   ;;  %s1231_s2 = inlined_call_operand.vmem [shape: f32[1,256], index: 2, kind: input, shape index: {}]   ;;  %s1232_s3 = inlined_call_operand.hbm [shape: bf16[256,256], index: 3, kind: input, shape index: {}]   ;;  %s1233_s4 = inlined_call_operand.vmem [shape: f32[1,256], index: 4, kind: input, shape index: {}]   ;;  %s1234_s5 = inlined_call_operand.hbm [shape: f32[8,256], index: 5, kind: output, shape index: {}]  }
   0x1   :  { %11 = vsyncpa [#allocation6], 0 }
   0x2   :  { %12 = vsyncpa [#allocation4], 0  ;;  %s1112_s18 = smov [#allocation2]   ;;  %s1040_s22 = scalar_lea.hbm %s1230_s1, 4096 }
   0x3   :  { %s20_s19 = sshll.u32 %s1112_s18, 4  ;;  %p1041_p0 = scmp.ne.s32.totalorder %s1230_s1, %s1040_s22  ;;  %s21_s19 = int_to_ptr.vmem [resolvable:$true] %s20_s19 }
   0x4   :  { %p1044_p1 = scmp.lt.u32.totalorder %s1040_s22, %s1230_s1 }
   0x6   :  { %p1046_p2 = pnand %p1044_p1, %p1041_p0 }
   0x8   :  { %1049 = shalt.err (!%p1046_p2)
}
   0x9   :  { %s1050_s27 = scalar_lea.vmem %s21_s19, 4096  ;;  %p1055_p4 = scmp.lt.s32.totalorder %s21_s19, %s21_s19 }
   0xa   :  { %p1051_p3 = scmp.ne.s32.totalorder %s21_s19, %s1050_s27  ;;  %p1056_p5 = scmp.lt.s32.totalorder %s1050_s27, %s1050_s27 }
   0xc   :  { %p1057_p6 = por %p1056_p5, %p1055_p4 }
   0xe   :  { %p1058_p7 = pnand %p1057_p6, %p1051_p3 }
  0x10   :  { %1061 = shalt.err (!%p1058_p7)
}
  0x11   :  { %s1113_s28 = smov 128   ;;  %s1114_s29 = smov 8  }
  0x12   :  { %26 = dma.hbm_to_vmem [thread:$0]  %s1230_s1, 4096, %s21_s19, [#allocation3], %s1113_s28, %s1113_s28, %s1114_s29  }
  0x13   :  { %s1115_s7 = smov [#allocation5]   ;;  %s1062_s11 = scalar_lea.hbm %s1232_s3, 4096 }
  0x14   :  { %s34_s8 = sshll.u32 %s1115_s7, 4  ;;  %p1063_p8 = scmp.ne.s32.totalorder %s1232_s3, %s1062_s11  ;;  %s35_s8 = int_to_ptr.vmem [resolvable:$true] %s34_s8 }
  0x15   :  { %p1066_p9 = scmp.lt.u32.totalorder %s1062_s11, %s1232_s3 }
  0x17   :  { %p1068_p10 = pnand %p1066_p9, %p1063_p8 }
  0x19   :  { %1071 = shalt.err (!%p1068_p10)
}
  0x1a   :  { %s1072_s16 = scalar_lea.vmem %s35_s8, 4096  ;;  %p1077_p12 = scmp.lt.s32.totalorder %s35_s8, %s35_s8 }
  0x1b   :  { %p1073_p11 = scmp.ne.s32.totalorder %s35_s8, %s1072_s16  ;;  %p1078_p13 = scmp.lt.s32.totalorder %s1072_s16, %s1072_s16 }
  0x1d   :  { %p1079_p0 = por %p1078_p13, %p1077_p12 }
  0x1f   :  { %p1080_p1 = pnand %p1079_p0, %p1073_p11 }
  0x21   :  { %1083 = shalt.err (!%p1080_p1)
}
  0x22   :  { %40 = dma.hbm_to_vmem [thread:$0]  %s1232_s3, 4096, %s35_s8, [#allocation6], %s1113_s28, %s1113_s28, %s1114_s29  }
  0x23   :  { %1106 = dma.done.wait [#allocation3], 4096  }
  0x24   :  { %1107 = vsyncadd [#allocation3], 4294963200 }
  0x25   :  { %1108 = dma.done.wait [#allocation6], 4096  }
  0x26   :  { %1109 = vsyncadd [#allocation6], 4294963200  ;;  %v1116_v0 = vmov 0   ;;  %v56_v1 = vld [vmem:[%s1229_s0] sm:$0xff]  ;;  %v933_v4 = vld [vmem:[#allocation2 + $0x94] ss:$8 sps:$4 sm:$0xff]   ;;  %v50_v19 = vlaneseq }
  0x27   :  { %929 = vset.pattern.permute.xlu0 %v1116_v0  ;;  %416 = vmatprep.mubr.bf16.mxu1 %v1116_v0  ;;  %v930_v2 = vld [vmem:[#allocation2 + $0x84] ss:$8 sps:$4 sm:$0xff]   ;;  %v932_v3 = vld [vmem:[#allocation2 + $0x80] ss:$8 sps:$4 sm:$0xff]   ;;  %v935_v5 = vld [vmem:[#allocation2 + $0x90] ss:$8 sps:$4 sm:$0xff]  }
  0x28   :  { %59 = vperm.xlu0 %929, %v56_v1   ;;  %384 = vmatprep.subr.bf16.mxu1 %v930_v2  ;;  %v936_v6 = vld [vmem:[#allocation2 + $0xa4] ss:$8 sps:$4 sm:$0xff]   ;;  %v938_v7 = vld [vmem:[#allocation2 + $0xa0] ss:$8 sps:$4 sm:$0xff]   ;;  %v939_v8 = vld [vmem:[#allocation2 + $0xb4] ss:$8 sps:$4 sm:$0xff]  }
  0x29   :  { %385 = vmatpush1.bf16.msra.mxu1 %v932_v3  ;;  %v941_v9 = vld [vmem:[#allocation2 + $0xb0] ss:$8 sps:$4 sm:$0xff]   ;;  %v942_v10 = vld [vmem:[#allocation2 + $0xc4] ss:$8 sps:$4 sm:$0xff]   ;;  %v944_v11 = vld [vmem:[#allocation2 + $0xc0] ss:$8 sps:$4 sm:$0xff]  }
  0x2a   :  { %386 = vmatprep.subr.bf16.mxu1 %v933_v4  ;;  %v945_v12 = vld [vmem:[#allocation2 + $0xd4] ss:$8 sps:$4 sm:$0xff]   ;;  %v947_v13 = vld [vmem:[#allocation2 + $0xd0] ss:$8 sps:$4 sm:$0xff]   ;;  %v948_v14 = vld [vmem:[#allocation2 + $0xe4] ss:$8 sps:$4 sm:$0xff]  }
  0x2b   :  { %v950_v15 = vld [vmem:[#allocation2 + $0xe0] ss:$8 sps:$4 sm:$0xff]   ;;  %v951_v16 = vld [vmem:[#allocation2 + $0xf4] ss:$8 sps:$4 sm:$0xff]   ;;  %v953_v17 = vld [vmem:[#allocation2 + $0xf0] ss:$8 sps:$4 sm:$0xff]  }
  0x2c   :  { %v956_v18 = vld [vmem:[#allocation2 + $0x4] ss:$8 sps:$4 sm:$0xff]   ;;  %v51_v20 = vand.u32 127, %v50_v19  ;;  %v1117_v37 = vmov 683565275   ;;  %s1123_s21 = smov [#allocation7]  }
  0x2d   :  { %387 = vmatpush1.bf16.msra.mxu1 %v935_v5  ;;  %v1118_v39 = vmov 2475754826   ;;  %v1119_v42 = vmov 2131351028   ;;  %v1120_v45 = vmov 2102212464  }
  0x2e   :  { %388 = vmatprep.subr.bf16.mxu1 %v936_v6  ;;  %v52_v21 = vcvt.s32.f32 %v51_v20  ;;  %v1121_v48 = vmov 920167782   ;;  %v1122_v51 = vmov 1326507024   ;;  %s829_s22 = sshll.u32 %s1123_s21, 4  ;;  %s830_s22 = int_to_ptr.vmem [resolvable:$true] %s829_s22 }
  0x2f   :  { %s1084_s23 = scalar_lea.vmem %s830_s22, 256  ;;  %p1089_p3 = scmp.lt.s32.totalorder %s830_s22, %s830_s22 }
  0x30   :  { %v53_v22 = vmul.f32 -0.071955785, %v52_v21  ;;  %p1085_p2 = scmp.ne.s32.totalorder %s830_s22, %s1084_s23  ;;  %p1090_p4 = scmp.lt.s32.totalorder %s1084_s23, %s1084_s23 }
  0x31   :  { %389 = vmatpush1.bf16.msra.mxu1 %v938_v7 }
  0x32   :  { %390 = vmatprep.subr.bf16.mxu1 %v939_v8  ;;  %v54_v23 = vmul.f32 1.442695, %v53_v22  ;;  %p1091_p5 = por %p1090_p4, %p1089_p3 }
  0x34   :  { %1026 = vpow2.f32 %v54_v23  ;;  %p1092_p6 = pnand %p1091_p5, %p1085_p2 }
  0x35   :  { %391 = vmatpush1.bf16.msra.mxu1 %v941_v9 }
  0x36   :  { %392 = vmatprep.subr.bf16.mxu1 %v942_v10 }
  0x39   :  { %393 = vmatpush1.bf16.msra.mxu1 %v944_v11 }
  0x3a   :  { %394 = vmatprep.subr.bf16.mxu1 %v945_v12 }
  0x3d   :  { %395 = vmatpush1.bf16.msra.mxu1 %v947_v13 }
  0x3e   :  { %396 = vmatprep.subr.bf16.mxu1 %v948_v14  ;;  %v1027_v24 = vpop.eup %1026 }
  0x41   :  { %397 = vmatpush1.bf16.msra.mxu1 %v950_v15 }
  0x42   :  { %398 = vmatprep.subr.bf16.mxu1 %v951_v16 }
  0x45   :  { %399 = vmatpush1.bf16.msra.mxu1 %v953_v17 }
  0x46   :  { %505 = vmatprep.subr.bf16.mxu1 %v956_v18 }
  0xa7   :  { %v60_v25 = vpop.permute.xlu0 %59 }
  0xa8   :  { %v1184_v26 = vmul.f32 %v1027_v24, %v60_v25 }
  0xaa   :  { %v66_v27 = vand.u32 2139095040, %v1184_v26  ;;  %v63_v31 = vand.u32 2147483647, %v1184_v26  ;;  %vm65_vm7 = vcmp.lt.s32.totalorder %v1184_v26, 0  ;;  %vm155_vm12 = vweird.f32 %v1184_v26 }
  0xac   :  { %v67_v28 = vshrl.u32 %v66_v27, 23  ;;  %v70_v34 = vand.u32 8388607, %v63_v31  ;;  %vm64_vm8 = vcmp.le.f32.partialorder %v63_v31, 0.7853982 }
  0xae   :  { %v839_v29 = vadd.s32 4294967169, %v67_v28  ;;  %v71_v53 = vor.u32 8388608, %v70_v34 }
  0xb0   :  { %v73_v30 = vadd.s32 1, %v839_v29  ;;  %v111_v4 = vshll.u32 %v71_v53, 8 }
  0xb2   :  { %vm74_vm0 = vcmp.gt.s32.totalorder %v73_v30, 0 }
  0xb3   :  { %v75_v32 = vsel %vm74_vm0, %v73_v30, 0 }
  0xb4   :  { %v77_v33 = vand.u32 31, %v75_v32  ;;  %v76_v36 = vshrl.u32 %v75_v32, 5 }
  0xb6   :  { %v78_v35 = vsub.s32 32, %v77_v33  ;;  %v80_v38 = vshll.u32 %v1117_v37, %v77_v33  ;;  %v83_v40 = vshll.u32 %v1118_v39, %v77_v33  ;;  %v86_v44 = vshll.u32 %v1119_v42, %v77_v33 }
  0xb7   :  { %v89_v47 = vshll.u32 %v1120_v45, %v77_v33  ;;  %v92_v50 = vshll.u32 %v1121_v48, %v77_v33  ;;  %vm95_vm1 = vcmp.lt.s32.totalorder %v76_v36, 1  ;;  %vm98_vm2 = vcmp.lt.s32.totalorder %v76_v36, 4 }
  0xb8   :  { %v81_v41 = vshrl.u32 %v1118_v39, %v78_v35  ;;  %v84_v43 = vshrl.u32 %v1119_v42, %v78_v35  ;;  %v87_v46 = vshrl.u32 %v1120_v45, %v78_v35  ;;  %v90_v49 = vshrl.u32 %v1121_v48, %v78_v35 }
  0xb9   :  { %v93_v52 = vshrl.u32 %v1122_v51, %v78_v35  ;;  %v79_v62 = vshrl.u32 %v1117_v37, %v78_v35  ;;  %vm97_vm3 = vcmp.lt.s32.totalorder %v76_v36, 3  ;;  %vm96_vm4 = vcmp.lt.s32.totalorder %v76_v36, 2 }
  0xba   :  { %v82_v54 = vor.u32 %v81_v41, %v80_v38  ;;  %v85_v55 = vor.u32 %v84_v43, %v83_v40  ;;  %v88_v56 = vor.u32 %v87_v46, %v86_v44  ;;  %v91_v57 = vor.u32 %v90_v49, %v89_v47 }
  0xbb   :  { %v94_v58 = vor.u32 %v93_v52, %v92_v50 }
  0xbc   :  { %v100_v59 = vsel %vm98_vm2, %v88_v56, 2102212464  ;;  %v103_v60 = vsel %vm95_vm1, %v82_v54, %v85_v55  ;;  %v107_v61 = vsel %vm95_vm1, %v85_v55, %v88_v56  ;;  %v104_v63 = vsel %vm98_vm2, %v91_v57, 920167782 }
  0xbd   :  { %v108_v1 = vsel %vm98_vm2, %v94_v58, 1326507024  ;;  %v105_v2 = vsel %vm97_vm3, %v88_v56, %v104_v63  ;;  %v99_v5 = vsel %vm95_vm1, %v79_v62, %v82_v54  ;;  %v101_v6 = vsel %vm97_vm3, %v85_v55, %v100_v59  ;;  %v954_v56 = vld [vmem:[#allocation2] ss:$8 sps:$4 sm:$0xff]   ;;  %v959_v59 = vld [vmem:[#allocation2 + $0x14] ss:$8 sps:$4 sm:$0xff]  }
  0xbe   :  { %v109_v3 = vsel %vm97_vm3, %v91_v57, %v108_v1  ;;  %v106_v7 = vsel %vm96_vm4, %v103_v60, %v105_v2  ;;  %v102_v13 = vsel %vm96_vm4, %v99_v5, %v101_v6  ;;  %v957_v60 = vld [vmem:[#allocation2 + $0x10] ss:$8 sps:$4 sm:$0xff]   ;;  %v960_v62 = vld [vmem:[#allocation2 + $0x20] ss:$8 sps:$4 sm:$0xff]   ;;  %v965_v63 = vld [vmem:[#allocation2 + $0x34] ss:$8 sps:$4 sm:$0xff]  }
  0xbf   :  { %v110_v8 = vsel %vm96_vm4, %v107_v61, %v109_v3  ;;  %v1193_v11 = vmul.u32.u64.low %v111_v4, %v106_v7  ;;  %v1194_v12 = vmul.u32.u64.high %v111_v4, %v106_v7, %v1193_v11  ;;  %v118_v15 = vmul.u32 %v111_v4, %v102_v13  ;;  %v962_v61 = vld [vmem:[#allocation2 + $0x24] ss:$8 sps:$4 sm:$0xff]   ;;  %v963_v1 = vld [vmem:[#allocation2 + $0x30] ss:$8 sps:$4 sm:$0xff]   ;;  %v966_v3 = vld [vmem:[#allocation2 + $0x40] ss:$8 sps:$4 sm:$0xff]  }
  0xc0   :  { %v1190_v9 = vmul.u32.u64.low %v111_v4, %v110_v8  ;;  %v1191_v10 = vmul.u32.u64.high %v111_v4, %v110_v8, %v1190_v9  ;;  %v968_v2 = vld [vmem:[#allocation2 + $0x44] ss:$8 sps:$4 sm:$0xff]   ;;  %v971_v4 = vld [vmem:[#allocation2 + $0x54] ss:$8 sps:$4 sm:$0xff]   ;;  %v969_v6 = vld [vmem:[#allocation2 + $0x50] ss:$8 sps:$4 sm:$0xff]  }
  0xc1   :  { %v121_v14 = vadd.s32 1, %v1194_v12  ;;  %v974_v7 = vld [vmem:[#allocation2 + $0x64] ss:$8 sps:$4 sm:$0xff]   ;;  %v972_v9 = vld [vmem:[#allocation2 + $0x60] ss:$8 sps:$4 sm:$0xff]  }
  0xc2   :  { %vm120_vm5 = vc.u32 %v1191_v10, %v1193_v11  ;;  %v119_v29 = vadd.s32 %v1193_v11, %v1191_v10  ;;  %v977_v10 = vld [vmem:[#allocation2 + $0x74] ss:$8 sps:$4 sm:$0xff]  }
  0xc3   :  { %v122_v16 = vsel %vm120_vm5, %v121_v14, %v1194_v12  ;;  %v975_v12 = vld [vmem:[#allocation2 + $0x70] ss:$8 sps:$4 sm:$0xff]  }
  0xc4   :  { %v123_v17 = vadd.s32 %v122_v16, %v118_v15  ;;  %v978_v15 = vld [vmem:[#allocation5 + $0x4] ss:$8 sps:$4 sm:$0xff]   ;;  %v980_v16 = vld [vmem:[#allocation5] ss:$8 sps:$4 sm:$0xff]  }
  0xc5   :  { %780 = vmatprep.subr.bf16.mxu0 %v978_v15 }
  0xc6   :  { %v124_v18 = vadd.s32 536870912, %v123_v17  ;;  %781 = vmatpush1.bf16.msra.mxu0 %v980_v16 }
  0xc8   :  { %v125_v20 = vshrl.u32 %v124_v18, 30  ;;  %v983_v18 = vld [vmem:[#allocation5 + $0x10] ss:$8 sps:$4 sm:$0xff]  }
  0xca   :  { %v126_v21 = vshll.u32 %v125_v20, 30  ;;  %v149_v42 = vsub.s32 4, %v125_v20 }
  0xcc   :  { %v127_v22 = vsub.s32 %v123_v17, %v126_v21  ;;  %v150_v45 = vsel %vm65_vm7, %v149_v42, %v125_v20  ;;  %v981_v17 = vld [vmem:[#allocation5 + $0x14] ss:$8 sps:$4 sm:$0xff]   ;;  %v984_v20 = vld [vmem:[#allocation5 + $0x24] ss:$8 sps:$4 sm:$0xff]   ;;  %v986_v21 = vld [vmem:[#allocation5 + $0x20] ss:$8 sps:$4 sm:$0xff]  }
  0xcd   :  { %v152_v47 = vsel %vm64_vm8, 0, %v150_v45  ;;  %782 = vmatprep.subr.bf16.mxu0 %v981_v17  ;;  %v1016_v42 = vld [vmem:[#allocation5 + $0xc0] ss:$8 sps:$4 sm:$0xff]   ;;  %v1020_v45 = vld [vmem:[#allocation5 + $0xe4] ss:$8 sps:$4 sm:$0xff]  }
  0xce   :  { %v129_v23 = vsub.s32 0, %v127_v22  ;;  %v260_v48 = vadd.s32 3, %v152_v47  ;;  %v156_v5 = vand.u32 3, %v152_v47  ;;  %783 = vmatpush1.bf16.msra.mxu0 %v983_v18  ;;  %v1023_v47 = vld [vmem:[#allocation5 + $0xf4] ss:$8 sps:$4 sm:$0xff]  }
  0xcf   :  { %784 = vmatprep.subr.bf16.mxu0 %v984_v20 }
  0xd0   :  { %v840_v24 = vmin.u32 %v129_v23, %v127_v22  ;;  %v261_v49 = vand.u32 3, %v260_v48  ;;  %vm158_vm13 = vcmp.eq.s32.totalorder %v156_v5, 0  ;;  %vm161_vm14 = vcmp.eq.s32.totalorder %v156_v5, 2  ;;  %v989_v23 = vld [vmem:[#allocation5 + $0x30] ss:$8 sps:$4 sm:$0xff]  }
  0xd1   :  { %vm157_vm15 = vcmp.lt.s32.totalorder %v156_v5, 2  ;;  %v1025_v48 = vld [vmem:[#allocation5 + $0xf0] ss:$8 sps:$4 sm:$0xff]  }
  0xd2   :  { %v131_v25 = vclz %v840_v24  ;;  %vm266_vm9 = vcmp.eq.s32.totalorder %v261_v49, 2  ;;  %vm263_vm10 = vcmp.eq.s32.totalorder %v261_v49, 0  ;;  %vm262_vm11 = vcmp.lt.s32.totalorder %v261_v49, 2  ;;  %785 = vmatpush1.bf16.msra.mxu0 %v986_v21  ;;  %v992_v24 = vld [vmem:[#allocation5 + $0x40] ss:$8 sps:$4 sm:$0xff]  }
  0xd4   :  { %v841_v27 = vadd.s32 4294967294, %v131_v25  ;;  %v993_v25 = vld [vmem:[#allocation5 + $0x54] ss:$8 sps:$4 sm:$0xff]  }
  0xd6   :  { %vm842_vm6 = vcmp.lt.s32.totalorder %v841_v27, 0 }
  0xd7   :  { %v134_v28 = vsel %vm842_vm6, 0, %v841_v27  ;;  %v995_v27 = vld [vmem:[#allocation5 + $0x50] ss:$8 sps:$4 sm:$0xff]  }
  0xd8   :  { %v135_v30 = vsub.s32 32, %v134_v28  ;;  %v139_v32 = vsub.s32 4294967266, %v134_v28  ;;  %v136_v33 = vshll.u32 %v127_v22, %v134_v28  ;;  %v987_v22 = vld [vmem:[#allocation5 + $0x34] ss:$8 sps:$4 sm:$0xff]   ;;  %v996_v28 = vld [vmem:[#allocation5 + $0x64] ss:$8 sps:$4 sm:$0xff]  }
  0xd9   :  { %786 = vmatprep.subr.bf16.mxu0 %v987_v22 }
  0xda   :  { %v137_v34 = vshrl.u32 %v119_v29, %v135_v30  ;;  %v140_v35 = vadd.s32 127, %v139_v32  ;;  %787 = vmatpush1.bf16.msra.mxu0 %v989_v23  ;;  %v998_v29 = vld [vmem:[#allocation5 + $0x60] ss:$8 sps:$4 sm:$0xff]   ;;  %v999_v30 = vld [vmem:[#allocation5 + $0x74] ss:$8 sps:$4 sm:$0xff]  }
  0xdb   :  { %v1001_v32 = vld [vmem:[#allocation5 + $0x70] ss:$8 sps:$4 sm:$0xff]  }
  0xdc   :  { %v138_v36 = vor.u32 %v137_v34, %v136_v33  ;;  %v141_v37 = vshll.u32 %v140_v35, 23  ;;  %v1002_v33 = vld [vmem:[#allocation5 + $0x84] ss:$8 sps:$4 sm:$0xff]   ;;  %v1004_v34 = vld [vmem:[#allocation5 + $0x80] ss:$8 sps:$4 sm:$0xff]  }
  0xdd   :  { %v1005_v35 = vld [vmem:[#allocation5 + $0x94] ss:$8 sps:$4 sm:$0xff]  }
  0xde   :  { %v142_v38 = vor.u32 4788187, %v141_v37  ;;  %v145_v40 = vcvt.s32.f32 %v138_v36  ;;  %v1007_v36 = vld [vmem:[#allocation5 + $0x90] ss:$8 sps:$4 sm:$0xff]   ;;  %v1008_v37 = vld [vmem:[#allocation5 + $0xa4] ss:$8 sps:$4 sm:$0xff]  }
  0xe0   :  { %v143_v39 = vand.u32 2147483647, %v142_v38  ;;  %v1010_v38 = vld [vmem:[#allocation5 + $0xa0] ss:$8 sps:$4 sm:$0xff]  }
  0xe2   :  { %v146_v41 = vmul.f32 %v145_v40, %v143_v39  ;;  %v1011_v39 = vld [vmem:[#allocation5 + $0xb4] ss:$8 sps:$4 sm:$0xff]   ;;  %v1013_v40 = vld [vmem:[#allocation5 + $0xb0] ss:$8 sps:$4 sm:$0xff]  }
  0xe4   :  { %v147_v43 = vxor.u32 2147483648, %v146_v41 }
  0xe6   :  { %v148_v44 = vsel %vm65_vm7, %v147_v43, %v146_v41  ;;  %v1014_v41 = vld [vmem:[#allocation5 + $0xc4] ss:$8 sps:$4 sm:$0xff]   ;;  %v1017_v43 = vld [vmem:[#allocation5 + $0xd4] ss:$8 sps:$4 sm:$0xff]  }
  0xe7   :  { %v151_v46 = vsel %vm64_vm8, %v1184_v26, %v148_v44  ;;  %v990_v26 = vld [vmem:[#allocation5 + $0x44] ss:$8 sps:$4 sm:$0xff]   ;;  %v1019_v44 = vld [vmem:[#allocation5 + $0xd0] ss:$8 sps:$4 sm:$0xff]  }
  0xe8   :  { %1028 = vcosq.f32 %v151_v46  ;;  %788 = vmatprep.subr.bf16.mxu0 %v990_v26 }
  0xe9   :  { %1030 = vsinq.f32 %v151_v46  ;;  %789 = vmatpush1.bf16.msra.mxu0 %v992_v24  ;;  %v1022_v46 = vld [vmem:[#allocation5 + $0xe0] ss:$8 sps:$4 sm:$0xff]  }
  0xea   :  { %790 = vmatprep.subr.bf16.mxu0 %v993_v25 }
  0xed   :  { %791 = vmatpush1.bf16.msra.mxu0 %v995_v27 }
  0xee   :  { %792 = vmatprep.subr.bf16.mxu0 %v996_v28 }
  0xf1   :  { %793 = vmatpush1.bf16.msra.mxu0 %v998_v29 }
  0xf2   :  { %v1029_v50 = vpop.eup %1028  ;;  %794 = vmatprep.subr.bf16.mxu0 %v999_v30 }
  0xf3   :  { %v1031_v51 = vpop.eup %1030  ;;  %v162_v52 = vxor.u32 2147483648, %v1029_v50 }
  0xf4   :  { %v159_v53 = vxor.u32 2147483648, %v1031_v51 }
  0xf5   :  { %v268_v54 = vsel %vm266_vm9, %v162_v52, %v1031_v51  ;;  %v163_v8 = vsel %vm161_vm14, %v162_v52, %v1031_v51  ;;  %795 = vmatpush1.bf16.msra.mxu0 %v1001_v32 }
  0xf6   :  { %v265_v55 = vsel %vm263_vm10, %v1029_v50, %v159_v53  ;;  %796 = vmatprep.subr.bf16.mxu0 %v1002_v33 }
  0xf7   :  { %v269_v31 = vsel %vm262_vm11, %v265_v55, %v268_v54  ;;  %v546_v55 = vld [vmem:[%s1231_s2] sm:$0x3] }
  0xf8   :  { %v270_v57 = vsel %vm155_vm12, nan, %v269_v31 }
  0xf9   :  { %v271_v58 = vpack.c.bf16 %v270_v57, %v270_v57  ;;  %797 = vmatpush1.bf16.msra.mxu0 %v1004_v34 }
  0xfa   :  { %798 = vmatprep.subr.bf16.mxu0 %v1005_v35 }
  0xfb   :  { %417 = vmatmul.mubr.bf16.vlgmr.msra.gmra.mrb[0].mxu1 %v271_v58 }
  0xfc   :  { %506 = vmatpush1.bf16.msra.mxu1 %v954_v56  ;;  %537 = vmatprep.mubr.bf16.mxu1 %v1116_v0  ;;  %v160_v0 = vsel %vm158_vm13, %v1029_v50, %v159_v53  ;;  %v549_v53 = vshrl.u32 %v50_v19, 7 }
  0xfd   :  { %507 = vmatprep.subr.bf16.mxu1 %v959_v59  ;;  %v164_v11 = vsel %vm157_vm15, %v160_v0, %v163_v8  ;;  %799 = vmatpush1.bf16.msra.mxu0 %v1007_v36 }
  0xfe   :  { %v165_v13 = vsel %vm155_vm12, nan, %v164_v11  ;;  %800 = vmatprep.subr.bf16.mxu0 %v1008_v37  ;;  %v550_v54 = vsub.s32 0, %v549_v53  ;;  %v554_v31 = vsub.s32 1, %v549_v53 }
  0xff   :  { %v166_v14 = vpack.c.bf16 %v165_v13, %v165_v13  ;;  %v608_v13 = vld [vmem:[%s1233_s4] sm:$0x3] }
 0x100   :  { %508 = vmatpush1.bf16.msra.mxu1 %v957_v60  ;;  %v551_v56 = vrot.slane %v546_v55, %v550_v54  ;;  %v555_v58 = vrot.slane %v546_v55, %v554_v31  ;;  %v617_v15 = vrot.slane %v608_v13, %v554_v31 }
 0x101   :  { %509 = vmatprep.subr.bf16.mxu1 %v962_v61  ;;  %801 = vmatpush1.bf16.msra.mxu0 %v1010_v38 }
 0x102   :  { %802 = vmatprep.subr.bf16.mxu0 %v1011_v39 }
 0x104   :  { %510 = vmatpush1.bf16.msra.mxu1 %v960_v62 }
 0x105   :  { %511 = vmatprep.subr.bf16.mxu1 %v965_v63  ;;  %803 = vmatpush1.bf16.msra.mxu0 %v1013_v40 }
 0x106   :  { %804 = vmatprep.subr.bf16.mxu0 %v1014_v41 }
 0x108   :  { %512 = vmatpush1.bf16.msra.mxu1 %v963_v1 }
 0x109   :  { %513 = vmatprep.subr.bf16.mxu1 %v968_v2  ;;  %805 = vmatpush1.bf16.msra.mxu0 %v1016_v42 }
 0x10a   :  { %806 = vmatprep.subr.bf16.mxu0 %v1017_v43 }
 0x10c   :  { %514 = vmatpush1.bf16.msra.mxu1 %v966_v3 }
 0x10d   :  { %515 = vmatprep.subr.bf16.mxu1 %v971_v4  ;;  %807 = vmatpush1.bf16.msra.mxu0 %v1019_v44 }
 0x10e   :  { %808 = vmatprep.subr.bf16.mxu0 %v1020_v45 }
 0x110   :  { %516 = vmatpush1.bf16.msra.mxu1 %v969_v6 }
 0x111   :  { %517 = vmatprep.subr.bf16.mxu1 %v974_v7  ;;  %809 = vmatpush1.bf16.msra.mxu0 %v1022_v46 }
 0x112   :  { %810 = vmatprep.subr.bf16.mxu0 %v1023_v47 }
 0x114   :  { %518 = vmatpush1.bf16.msra.mxu1 %v972_v9 }
 0x115   :  { %519 = vmatprep.subr.bf16.mxu1 %v977_v10  ;;  %811 = vmatpush1.bf16.msra.mxu0 %v1025_v48 }
 0x118   :  { %520 = vmatpush1.bf16.msra.mxu1 %v975_v12 }
 0x11b   :  { %538 = vmatmul.mubr.bf16.vlgmr.msra.gmra.mrb[4].mxu1 %v166_v14  ;;  %v613_v14 = vrot.slane %v608_v13, %v550_v54 }
 0x1ce   :  { %v418_v49 = vpop.f32.mrb[0].mxu1 }
 0x1cf   :  { %v420_v50 = vpop.f32.mrb[1].mxu1 }
 0x1d0   :  { %v422_v51 = vpop.f32.mrb[2].mxu1 }
 0x1d1   :  { %v423_v52 = vpop.f32.mrb[3].mxu1 }
 0x1ee   :  { %v539_v57 = vpop.f32.mrb[4].mxu1 }
 0x1ef   :  { %v540_v59 = vadd.f32 %v539_v57, %v418_v49  ;;  %v541_v60 = vpop.f32.mrb[5].mxu1 }
 0x1f0   :  { %v542_v61 = vadd.f32 %v541_v60, %v420_v50  ;;  %v543_v62 = vpop.f32.mrb[6].mxu1 }
 0x1f1   :  { %v558_v63 = vadd.f32 %v551_v56, %v540_v59  ;;  %v544_v1 = vpop.f32.mrb[7].mxu1 }
 0x1f2   :  { %v559_v2 = vadd.f32 %v555_v58, %v542_v61 }
 0x1f3   :  { %v879_v3 = vmul.f32 -1.442695, %v558_v63 }
 0x1f4   :  { %v880_v4 = vmul.f32 -1.442695, %v559_v2 }
 0x1f5   :  { %1032 = vpow2.f32 %v879_v3 }
 0x1f6   :  { %1034 = vpow2.f32 %v880_v4 }
 0x1ff   :  { %v1033_v19 = vpop.eup %1032 }
 0x200   :  { %v1035_v5 = vpop.eup %1034  ;;  %v566_v6 = vadd.f32 1.0, %v1033_v19 }
 0x201   :  { %v567_v7 = vadd.f32 1.0, %v1035_v5 }
 0x202   :  { %1036 = vrcp.f32 %v566_v6 }
 0x203   :  { %1038 = vrcp.f32 %v567_v7 }
 0x20c   :  { %v1037_v0 = vpop.eup %1036 }
 0x20d   :  { %v1039_v8 = vpop.eup %1038  ;;  %v572_v9 = vmul.f32 %v1037_v0, %v558_v63 }
 0x20e   :  { %v573_v10 = vmul.f32 %v1039_v8, %v559_v2 }
 0x20f   :  { %v574_v12 = vpack.c.bf16 %v572_v9, %v572_v9 }
 0x210   :  { %v575_v11 = vpack.c.bf16 %v573_v10, %v573_v10 }
 0x212   :  { %812 = vmatprep.mubr.bf16.mxu0 %v575_v11 }
 0x213   :  { %813 = vmatmul.mubr.bf16.vlgmr.msra.gmra.mrb[0].mxu0 %v574_v12 }
 0x2e6   :  { %v814_v16 = vpop.f32.mrb[0].mxu0 }
 0x2e7   :  { %v815_v17 = vadd.f32 %v814_v16, %v613_v14  ;;  %v816_v18 = vpop.f32.mrb[1].mxu0 }
 0x2e8   :  { %v817_v20 = vadd.f32 %v816_v18, %v617_v15  ;;  %v818_v21 = vpop.f32.mrb[2].mxu0 }
 0x2e9   :  { %821 = vst [vmem:[#allocation7] sm:$0xff] %v815_v17  ;;  %v819_v22 = vpop.f32.mrb[3].mxu0 }
 0x2ea   :  { %822 = vst [vmem:[#allocation7 + $0x8] sm:$0xff] %v817_v20 }
 0x2eb   :  { %1095 = shalt.err (!%p1092_p6)
}
 0x2ec   :  { %s1096_s25 = scalar_lea.hbm %s1234_s5, 256 }
 0x2ed   :  { %p1097_p7 = scmp.ne.s32.totalorder %s1234_s5, %s1096_s25  ;;  %p1100_p8 = scmp.lt.u32.totalorder %s1096_s25, %s1234_s5 }
 0x2ef   :  { %p1102_p9 = pnand %p1100_p8, %p1097_p7 }
 0x2f1   :  { %1105 = shalt.err (!%p1102_p9)
}
 0x2f2   :  { %832 = dma.vmem_to_hbm [thread:$0]  %s830_s22, 256, %s1234_s5, [#allocation4]  }
 0x2f3   :  { %1110 = dma.done.wait [#allocation4], 256  }
 0x2f4   :  { %1111 = vsyncadd [#allocation4], 4294967040 }
 0x2f5   :  { %836 = vsyncpa [#allocation3], 1 }
 0x2f6   :  { %837 = vsyncpa [#allocation6], 1 }
 0x2f7   :  { %838 = vsyncpa [#allocation4], 1 }

</bundles_post_ra>
